<compile_context>
chip_gen: v7x
topology: tpu7x:2x2x1
jax: 0.10.0
libtpu: 0.0.40
codegen_flags: <defaults>
</compile_context>

<pallas_src>
import functools

import jax
import jax.numpy as jnp
from jax.experimental import pallas as pl
from jax.experimental.pallas import tpu as pltpu

_HID_BRANCH = 128            # per-branch hidden width
_HID_CAT = 4 * _HID_BRANCH   # 512 after (fused) concat
_HID_TRUNK = 256
_OUT_PAD = 128               # lane-dense padded output width


def _round_up(x, m):
    return -(-x // m) * m


def _fused_forward_kernel(x_ref, wb_ref, bb_ref, w1_ref, b1_ref,
                          w2_ref, b2_ref, w3_ref, b3_ref, out_ref,
                          *, max_action):
    f32 = jnp.float32
    bf16 = jnp.bfloat16

    def linear(x_bf16, w_ref, b_ref):
        # bf16 operands on the MXU, f32 accumulation; bias add in f32.
        return jnp.dot(x_bf16, w_ref[...], preferred_element_type=f32) + b_ref[...]

    def relu_bf16(y_f32):
        # ReLU in f32 (VPU), cast to bf16 so the next MXU pass and any VMEM
        # spill of the intermediate are half-width.
        return jnp.maximum(y_f32, 0.0).astype(bf16)

    # Fused branch layer: one (TB, 36) @ (36, 512) matmul replaces the four
    # K<=16 branch matmuls and the lane concat (weight is block-diagonal).
    h = relu_bf16(linear(x_ref[...], wb_ref, bb_ref))     # (TB, 512) bf16
    # Trunk: 512 -> 256 ReLU -> 256 -> 256 ReLU -> 256 -> 128(pad) Tanh
    h = relu_bf16(linear(h, w1_ref, b1_ref))              # (TB, 256) bf16
    h = relu_bf16(linear(h, w2_ref, b2_ref))              # (TB, 256) bf16
    out = jnp.tanh(linear(h, w3_ref, b3_ref))             # (TB, 128) f32
    if max_action != 1.0:                                 # elide *1.0
        out = out * max_action
    out_ref[...] = out.astype(out_ref.dtype)


def multi_pair_ax_forward(state, action, source_context, target_context,
                          fused_params, *, max_action=1.0, batch_tile=2048):
    """MultiPairAxmodel forward as one Pallas kernel call.

    `fused_params` must come from `pack_params` (block-diagonal bf16 branch
    weight, lane-padded last layer).
    """
    bf16 = jnp.bfloat16
    action_dim = action.shape[1]
    B = action.shape[0]

    # Pack inputs in the SAME order as torch.cat((action, state, src, tgt), 1),
    # directly in bf16.  Batch pad is fused as one extra concatenated row block.
    x = jnp.concatenate(
        [action.astype(bf16), state.astype(bf16),
         source_context.astype(bf16), target_context.astype(bf16)], axis=1)
    d_in = x.shape[1]

    # Batch tiling: sublane-align, then ensure >= 2 parallel grid steps when
    # the batch allows it (v7x has 2 TensorCores).
    b_pad = _round_up(B, 8)
    tb = _round_up(max(8, min(int(batch_tile), b_pad)), 8)
    if b_pad >= 16 and b_pad <= tb:
        tb = _round_up(b_pad // 2, 8)
    b_pad = _round_up(b_pad, tb)
    if b_pad != B:
        x = jnp.concatenate([x, jnp.zeros((b_pad - B, d_in), bf16)], axis=0)
    grid = (b_pad // tb,)

    wb, bb = fused_params["w_branch"], fused_params["b_branch"]
    w1, b1 = fused_params["w1"], fused_params["b1"]
    w2, b2 = fused_params["w2"], fused_params["b2"]
    w3, b3 = fused_params["w3"], fused_params["b3"]

    def resident(arr):  # same block for every grid step -> stays in VMEM
        nd = arr.ndim
        return pl.BlockSpec(arr.shape, lambda i, _nd=nd: (0,) * _nd)

    flops = 2 * b_pad * (d_in * _HID_CAT + _HID_CAT * _HID_TRUNK
                         + _HID_TRUNK * _HID_TRUNK + _HID_TRUNK * _OUT_PAD)
    bytes_params = sum(int(a.size) * a.dtype.itemsize
                       for a in (wb, bb, w1, b1, w2, b2, w3, b3))
    bytes_accessed = (bytes_params + int(x.size) * x.dtype.itemsize
                      + b_pad * _OUT_PAD * 4)

    out = pl.pallas_call(
        functools.partial(_fused_forward_kernel, max_action=float(max_action)),
        out_shape=jax.ShapeDtypeStruct((b_pad, _OUT_PAD), jnp.float32),
        grid=grid,
        in_specs=[
            pl.BlockSpec((tb, d_in), lambda i: (i, 0)),   # activations: tiled over B
            resident(wb), resident(bb),
            resident(w1), resident(b1),
            resident(w2), resident(b2),
            resident(w3), resident(b3),
        ],
        out_specs=pl.BlockSpec((tb, _OUT_PAD), lambda i: (i, 0)),
        compiler_params=pltpu.CompilerParams(
            dimension_semantics=("parallel",),            # shard B across TCs (v7x)
            vmem_limit_bytes=48 * 1024 * 1024),           # fits v7x 64 MiB VMEM
        cost_estimate=pl.CostEstimate(
            flops=flops,
            transcendentals=b_pad * _OUT_PAD,             # tanh on the padded output
            bytes_accessed=bytes_accessed),
    )(x, wb, bb, w1, b1, w2, b2, w3, b3)

    return out[:B, :action_dim]


def init_params(key, state_dim, action_dim, context_dim):
    """PyTorch-style per-layer params (weights stored as (in, out)), f32."""
    def linear_init(k, fan_in, fan_out):
        kw, kb = jax.random.split(k)
        bound = 1.0 / jnp.sqrt(jnp.float32(fan_in))
        w = jax.random.uniform(kw, (fan_in, fan_out), jnp.float32, -bound, bound)
        b = jax.random.uniform(kb, (1, fan_out), jnp.float32, -bound, bound)
        return w, b

    keys = jax.random.split(key, 7)
    w_s, b_s = linear_init(keys[0], state_dim, _HID_BRANCH)
    w_a, b_a = linear_init(keys[1], action_dim, _HID_BRANCH)
    w_sc, b_sc = linear_init(keys[2], context_dim, _HID_BRANCH)
    w_tc, b_tc = linear_init(keys[3], context_dim, _HID_BRANCH)
    w1, b1 = linear_init(keys[4], _HID_CAT, _HID_TRUNK)
    w2, b2 = linear_init(keys[5], _HID_TRUNK, _HID_TRUNK)
    w3, b3 = linear_init(keys[6], _HID_TRUNK, action_dim)
    return dict(w_s=w_s, b_s=b_s, w_a=w_a, b_a=b_a,
                w_sc=w_sc, b_sc=b_sc, w_tc=w_tc, b_tc=b_tc,
                w1=w1, b1=b1, w2=w2, b2=b2, w3=w3, b3=b3)


def pack_params(p, state_dim, action_dim, context_dim):
    """One-time packing for the fused kernel.

    * Block-diagonal branch weight (bf16) + concatenated f32 bias; block order
      matches the reference concat order (action, state, src_ctx, tgt_ctx) and
      column offsets are derived from _HID_BRANCH.
    * Trunk weights cast to bf16; biases stay f32.
    * Last layer zero-padded from action_dim to _OUT_PAD lanes (lane-dense
      MXU pass + unmasked stores; padded lanes give tanh(0)=0 and are sliced
      off in the wrapper).
    """
    H = _HID_BRANCH
    d_in = action_dim + state_dim + 2 * context_dim
    wb = jnp.zeros((d_in, _HID_CAT), jnp.float32)
    blocks = [("w_a", action_dim), ("w_s", state_dim),
              ("w_sc", context_dim), ("w_tc", context_dim)]
    row = 0
    for i, (name, fan_in) in enumerate(blocks):
        wb = wb.at[row:row + fan_in, i * H:(i + 1) * H].set(p[name])
        row += fan_in
    bb = jnp.concatenate([p["b_a"], p["b_s"], p["b_sc"], p["b_tc"]], axis=1)

    w3 = jnp.zeros((_HID_TRUNK, _OUT_PAD), jnp.float32)
    w3 = w3.at[:, :action_dim].set(p["w3"])
    b3 = jnp.zeros((1, _OUT_PAD), jnp.float32)
    b3 = b3.at[:, :action_dim].set(p["b3"])

    bf16 = jnp.bfloat16
    return dict(w_branch=wb.astype(bf16), b_branch=bb.astype(jnp.float32),
                w1=p["w1"].astype(bf16), b1=p["b1"].astype(jnp.float32),
                w2=p["w2"].astype(bf16), b2=p["b2"].astype(jnp.float32),
                w3=w3.astype(bf16), b3=b3.astype(jnp.float32))


def reference_forward(state, action, source_context, target_context, p,
                      max_action=1.0):
    """Pure-JAX f32 reference mirroring the PyTorch module exactly."""
    relu = lambda x: jnp.maximum(x, 0.0)
    a = relu(action @ p["w_a"] + p["b_a"])
    s = relu(state @ p["w_s"] + p["b_s"])
    sc = relu(source_context @ p["w_sc"] + p["b_sc"])
    tc = relu(target_context @ p["w_tc"] + p["b_tc"])
    h = jnp.concatenate([a, s, sc, tc], axis=1)
    h = relu(h @ p["w1"] + p["b1"])
    h = relu(h @ p["w2"] + p["b2"])
    return jnp.tanh(h @ p["w3"] + p["b3"]) * max_action


if __name__ == "__main__":
    # Small shapes consistent with the module's forward.
    B, state_dim, action_dim, context_dim = 8, 16, 4, 8
    max_action = 1.0  # matches the PyTorch module's constructor default

    key = jax.random.PRNGKey(0)
    k_params, k_s, k_a, k_sc, k_tc = jax.random.split(key, 5)

    params = init_params(k_params, state_dim, action_dim, context_dim)
    fused = pack_params(params, state_dim, action_dim, context_dim)  # packed once

    state = jax.random.normal(k_s, (B, state_dim), jnp.float32)
    action = jax.random.normal(k_a, (B, action_dim), jnp.float32)
    source_context = jax.random.normal(k_sc, (B, context_dim), jnp.float32)
    target_context = jax.random.normal(k_tc, (B, context_dim), jnp.float32)

    out = multi_pair_ax_forward(state, action, source_context, target_context,
                                fused, max_action=max_action)
    out = jax.block_until_ready(out)

    ref = reference_forward(state, action, source_context, target_context,
                            params, max_action)
    assert out.shape == (B, action_dim)
    assert bool(jnp.all(jnp.isfinite(out)))
    # bf16 MXU operands (f32 accumulation) vs f32 reference -> relaxed tolerance.
    assert jnp.allclose(out, ref, atol=5e-2, rtol=5e-2)

    print("KERNEL_OK")
</pallas_src>

<mosaic_0001>
module attributes {stable_mosaic.version = 11 : i64} {
  func.func @_fused_forward_kernel(%arg0: i32, %arg1: memref<8x36xbf16, #tpu.memory_space<vmem>>, %arg2: memref<36x512xbf16, #tpu.memory_space<vmem>>, %arg3: memref<1x512xf32, #tpu.memory_space<vmem>>, %arg4: memref<512x256xbf16, #tpu.memory_space<vmem>>, %arg5: memref<1x256xf32, #tpu.memory_space<vmem>>, %arg6: memref<256x256xbf16, #tpu.memory_space<vmem>>, %arg7: memref<1x256xf32, #tpu.memory_space<vmem>>, %arg8: memref<256x128xbf16, #tpu.memory_space<vmem>>, %arg9: memref<1x128xf32, #tpu.memory_space<vmem>>, %arg10: memref<8x128xf32, #tpu.memory_space<vmem>>) attributes {dimension_semantics = [#tpu.dimension_semantics<parallel>], iteration_bounds = array<i64: 1>, scalar_prefetch = 0 : i64, scratch_operands = 0 : i64, tpu.core_type = #tpu.core_type<tc>, window_params = [{transform_indices = @transform_0, window_bounds = array<i64: 8, 36>}, {pipeline_mode = #tpu.pipeline_mode<synchronous>, transform_indices = @transform_1, window_bounds = array<i64: 36, 512>}, {pipeline_mode = #tpu.pipeline_mode<synchronous>, transform_indices = @transform_2, window_bounds = array<i64: 1, 512>}, {pipeline_mode = #tpu.pipeline_mode<synchronous>, transform_indices = @transform_3, window_bounds = array<i64: 512, 256>}, {pipeline_mode = #tpu.pipeline_mode<synchronous>, transform_indices = @transform_4, window_bounds = array<i64: 1, 256>}, {pipeline_mode = #tpu.pipeline_mode<synchronous>, transform_indices = @transform_5, window_bounds = array<i64: 256, 256>}, {pipeline_mode = #tpu.pipeline_mode<synchronous>, transform_indices = @transform_6, window_bounds = array<i64: 1, 256>}, {pipeline_mode = #tpu.pipeline_mode<synchronous>, transform_indices = @transform_7, window_bounds = array<i64: 256, 128>}, {pipeline_mode = #tpu.pipeline_mode<synchronous>, transform_indices = @transform_8, window_bounds = array<i64: 1, 128>}, {transform_indices = @transform_9, window_bounds = array<i64: 8, 128>}]} {
    %c0 = arith.constant 0 : index
    %c0_0 = arith.constant 0 : index
    %0 = vector.load %arg1[%c0, %c0_0] : memref<8x36xbf16, #tpu.memory_space<vmem>>, vector<8x36xbf16>
    %c0_1 = arith.constant 0 : index
    %c0_2 = arith.constant 0 : index
    %1 = vector.load %arg2[%c0_1, %c0_2] : memref<36x512xbf16, #tpu.memory_space<vmem>>, vector<36x512xbf16>
    %cst = arith.constant dense<0.000000e+00> : vector<8x512xf32>
    %2 = tpu.matmul %0, %1, %cst {dimension_numbers = #tpu.dot_dimension_numbers<[1], [0], [0], [1], [0, 0, 1, 1], [], []>} : vector<8x36xbf16>, vector<36x512xbf16>, vector<8x512xf32> -> vector<8x512xf32>
    %c0_3 = arith.constant 0 : index
    %c0_4 = arith.constant 0 : index
    %3 = vector.load %arg3[%c0_3, %c0_4] : memref<1x512xf32, #tpu.memory_space<vmem>>, vector<1x512xf32>
    %4 = vector.broadcast %3 : vector<1x512xf32> to vector<8x512xf32>
    %5 = arith.addf %2, %4 : vector<8x512xf32>
    %cst_5 = arith.constant 0.000000e+00 : f32
    %6 = vector.broadcast %cst_5 : f32 to vector<8x512xf32>
    %7 = arith.maximumf %5, %6 : vector<8x512xf32>
    %8 = arith.truncf %7 : vector<8x512xf32> to vector<8x512xbf16>
    %c0_6 = arith.constant 0 : index
    %c0_7 = arith.constant 0 : index
    %9 = vector.load %arg4[%c0_6, %c0_7] : memref<512x256xbf16, #tpu.memory_space<vmem>>, vector<512x256xbf16>
    %cst_8 = arith.constant dense<0.000000e+00> : vector<8x256xf32>
    %10 = tpu.matmul %8, %9, %cst_8 {dimension_numbers = #tpu.dot_dimension_numbers<[1], [0], [0], [1], [0, 0, 1, 1], [], []>} : vector<8x512xbf16>, vector<512x256xbf16>, vector<8x256xf32> -> vector<8x256xf32>
    %c0_9 = arith.constant 0 : index
    %c0_10 = arith.constant 0 : index
    %11 = vector.load %arg5[%c0_9, %c0_10] : memref<1x256xf32, #tpu.memory_space<vmem>>, vector<1x256xf32>
    %12 = vector.broadcast %11 : vector<1x256xf32> to vector<8x256xf32>
    %13 = arith.addf %10, %12 : vector<8x256xf32>
    %cst_11 = arith.constant 0.000000e+00 : f32
    %14 = vector.broadcast %cst_11 : f32 to vector<8x256xf32>
    %15 = arith.maximumf %13, %14 : vector<8x256xf32>
    %16 = arith.truncf %15 : vector<8x256xf32> to vector<8x256xbf16>
    %c0_12 = arith.constant 0 : index
    %c0_13 = arith.constant 0 : index
    %17 = vector.load %arg6[%c0_12, %c0_13] : memref<256x256xbf16, #tpu.memory_space<vmem>>, vector<256x256xbf16>
    %cst_14 = arith.constant dense<0.000000e+00> : vector<8x256xf32>
    %18 = tpu.matmul %16, %17, %cst_14 {dimension_numbers = #tpu.dot_dimension_numbers<[1], [0], [0], [1], [0, 0, 1, 1], [], []>} : vector<8x256xbf16>, vector<256x256xbf16>, vector<8x256xf32> -> vector<8x256xf32>
    %c0_15 = arith.constant 0 : index
    %c0_16 = arith.constant 0 : index
    %19 = vector.load %arg7[%c0_15, %c0_16] : memref<1x256xf32, #tpu.memory_space<vmem>>, vector<1x256xf32>
    %20 = vector.broadcast %19 : vector<1x256xf32> to vector<8x256xf32>
    %21 = arith.addf %18, %20 : vector<8x256xf32>
    %cst_17 = arith.constant 0.000000e+00 : f32
    %22 = vector.broadcast %cst_17 : f32 to vector<8x256xf32>
    %23 = arith.maximumf %21, %22 : vector<8x256xf32>
    %24 = arith.truncf %23 : vector<8x256xf32> to vector<8x256xbf16>
    %c0_18 = arith.constant 0 : index
    %c0_19 = arith.constant 0 : index
    %25 = vector.load %arg8[%c0_18, %c0_19] : memref<256x128xbf16, #tpu.memory_space<vmem>>, vector<256x128xbf16>
    %cst_20 = arith.constant dense<0.000000e+00> : vector<8x128xf32>
    %26 = tpu.matmul %24, %25, %cst_20 {dimension_numbers = #tpu.dot_dimension_numbers<[1], [0], [0], [1], [0, 0, 1, 1], [], []>} : vector<8x256xbf16>, vector<256x128xbf16>, vector<8x128xf32> -> vector<8x128xf32>
    %c0_21 = arith.constant 0 : index
    %c0_22 = arith.constant 0 : index
    %27 = vector.load %arg9[%c0_21, %c0_22] : memref<1x128xf32, #tpu.memory_space<vmem>>, vector<1x128xf32>
    %28 = vector.broadcast %27 : vector<1x128xf32> to vector<8x128xf32>
    %29 = arith.addf %26, %28 : vector<8x128xf32>
    %30 = math.tanh %29 : vector<8x128xf32>
    %c0_23 = arith.constant 0 : index
    %c0_24 = arith.constant 0 : index
    %31 = vector.load %arg10[%c0_23, %c0_24] : memref<8x128xf32, #tpu.memory_space<vmem>>, vector<8x128xf32>
    tpu.vector_store %arg10[%c0_23, %c0_24], %30 {strides = array<i32>} : memref<8x128xf32, #tpu.memory_space<vmem>>, vector<8x128xf32>,
    return
  }
  func.func @transform_0(%arg0: i32) -> (i32, i32) {
    %c0_i32 = arith.constant 0 : i32
    %c0_i32_0 = arith.constant 0 : i32
    return %arg0, %c0_i32 : i32, i32
  }
  func.func @transform_1(%arg0: i32) -> (i32, i32) {
    %c0_i32 = arith.constant 0 : i32
    %c0_i32_0 = arith.constant 0 : i32
    %c0_i32_1 = arith.constant 0 : i32
    return %c0_i32, %c0_i32_0 : i32, i32
  }
  func.func @transform_2(%arg0: i32) -> (i32, i32) {
    %c0_i32 = arith.constant 0 : i32
    %c0_i32_0 = arith.constant 0 : i32
    %c0_i32_1 = arith.constant 0 : i32
    return %c0_i32, %c0_i32_0 : i32, i32
  }
  func.func @transform_3(%arg0: i32) -> (i32, i32) {
    %c0_i32 = arith.constant 0 : i32
    %c0_i32_0 = arith.constant 0 : i32
    %c0_i32_1 = arith.constant 0 : i32
    return %c0_i32, %c0_i32_0 : i32, i32
  }
  func.func @transform_4(%arg0: i32) -> (i32, i32) {
    %c0_i32 = arith.constant 0 : i32
    %c0_i32_0 = arith.constant 0 : i32
    %c0_i32_1 = arith.constant 0 : i32
    return %c0_i32, %c0_i32_0 : i32, i32
  }
  func.func @transform_5(%arg0: i32) -> (i32, i32) {
    %c0_i32 = arith.constant 0 : i32
    %c0_i32_0 = arith.constant 0 : i32
    %c0_i32_1 = arith.constant 0 : i32
    return %c0_i32, %c0_i32_0 : i32, i32
  }
  func.func @transform_6(%arg0: i32) -> (i32, i32) {
    %c0_i32 = arith.constant 0 : i32
    %c0_i32_0 = arith.constant 0 : i32
    %c0_i32_1 = arith.constant 0 : i32
    return %c0_i32, %c0_i32_0 : i32, i32
  }
  func.func @transform_7(%arg0: i32) -> (i32, i32) {
    %c0_i32 = arith.constant 0 : i32
    %c0_i32_0 = arith.constant 0 : i32
    %c0_i32_1 = arith.constant 0 : i32
    return %c0_i32, %c0_i32_0 : i32, i32
  }
  func.func @transform_8(%arg0: i32) -> (i32, i32) {
    %c0_i32 = arith.constant 0 : i32
    %c0_i32_0 = arith.constant 0 : i32
    %c0_i32_1 = arith.constant 0 : i32
    return %c0_i32, %c0_i32_0 : i32, i32
  }
  func.func @transform_9(%arg0: i32) -> (i32, i32) {
    %c0_i32 = arith.constant 0 : i32
    %c0_i32_0 = arith.constant 0 : i32
    return %arg0, %c0_i32 : i32, i32
  }
}

</mosaic_0001>

<bundles_post_ra>
// kernel: tpu_custom_call.1
= control target key start
LH: loop header
LB: loop body
LE: loop exit
PB: predicated region body
PF: predicated region fallthrough
CT: control target
= control target key end

     0   :  { %14 = vsyncpa [#allocation3], 0  ;;  %s1884_s0 = inlined_call_operand.hbm [shape: bf16[8,36], index: 0, kind: input, shape index: {}]   ;;  %s1885_s1 = inlined_call_operand.hbm [shape: bf16[36,512], index: 1, kind: input, shape index: {}]   ;;  %s1886_s2 = inlined_call_operand.vmem [shape: f32[1,512], index: 2, kind: input, shape index: {}]   ;;  %s1887_s3 = inlined_call_operand.hbm [shape: bf16[512,256], index: 3, kind: input, shape index: {}]   ;;  %s1888_s4 = inlined_call_operand.vmem [shape: f32[1,256], index: 4, kind: input, shape index: {}]   ;;  %s1889_s5 = inlined_call_operand.hbm [shape: bf16[256,256], index: 5, kind: input, shape index: {}]   ;;  %s1890_s6 = inlined_call_operand.vmem [shape: f32[1,256], index: 6, kind: input, shape index: {}]   ;;  %s1891_s7 = inlined_call_operand.hbm [shape: bf16[256,128], index: 7, kind: input, shape index: {}]   ;;  %s1892_s8 = inlined_call_operand.vmem [shape: f32[1,128], index: 8, kind: input, shape index: {}]   ;;  %s1893_s9 = inlined_call_operand.hbm [shape: f32[8,128], index: 9, kind: output, shape index: {}]  }
   0x1   :  { %15 = vsyncpa [#allocation6], 0 }
   0x2   :  { %16 = vsyncpa [#allocation9], 0 }
   0x3   :  { %17 = vsyncpa [#allocation4], 0  ;;  %s1703_s30 = smov [#allocation5]   ;;  %s1563_s13 = scalar_lea.hbm %s1885_s1, 1280 }
   0x4   :  { %s33_s10 = sshll.u32 %s1703_s30, 4  ;;  %p1564_p0 = scmp.ne.s32.totalorder %s1885_s1, %s1563_s13  ;;  %s34_s10 = int_to_ptr.vmem [resolvable:$true] %s33_s10 }
   0x5   :  { %p1567_p1 = scmp.lt.u32.totalorder %s1563_s13, %s1885_s1 }
   0x7   :  { %p1569_p2 = pnand %p1567_p1, %p1564_p0 }
   0x9   :  { %1572 = shalt.err (!%p1569_p2)
}
   0xa   :  { %s1573_s18 = scalar_lea.vmem %s34_s10, 1280  ;;  %p1578_p4 = scmp.lt.s32.totalorder %s34_s10, %s34_s10 }
   0xb   :  { %p1574_p3 = scmp.ne.s32.totalorder %s34_s10, %s1573_s18  ;;  %p1579_p5 = scmp.lt.s32.totalorder %s1573_s18, %s1573_s18 }
   0xd   :  { %p1580_p6 = por %p1579_p5, %p1578_p4 }
   0xf   :  { %p1581_p7 = pnand %p1580_p6, %p1574_p3 }
  0x11   :  { %1584 = shalt.err (!%p1581_p7)
}
  0x12   :  { %s1704_s19 = smov 256   ;;  %s1705_s20 = smov 16  }
  0x13   :  { %39 = dma.hbm_to_vmem [thread:$0]  %s1885_s1, 1280, %s34_s10, [#allocation6], %s1704_s19, %s1704_s19, %s1705_s20  }
  0x14   :  { %s1706_s23 = smov [#allocation8]   ;;  %s1707_s25 = smov [#allocation2]  }
  0x15   :  { %s61_s24 = sshll.u32 %s1706_s23, 4  ;;  %s24_s26 = sshll.u32 %s1707_s25, 4  ;;  %s62_s24 = int_to_ptr.vmem [resolvable:$true] %s61_s24  ;;  %s25_s26 = int_to_ptr.vmem [resolvable:$true] %s24_s26 }
  0x16   :  { %s1585_s29 = scalar_lea.hbm %s1889_s5, 4096 }
  0x17   :  { %p1586_p8 = scmp.ne.s32.totalorder %s1889_s5, %s1585_s29  ;;  %p1589_p9 = scmp.lt.u32.totalorder %s1585_s29, %s1889_s5 }
  0x19   :  { %p1591_p10 = pnand %p1589_p9, %p1586_p8 }
  0x1b   :  { %1594 = shalt.err (!%p1591_p10)
}
  0x1c   :  { %s1595_s1 = scalar_lea.vmem %s62_s24, 4096  ;;  %p1600_p12 = scmp.lt.s32.totalorder %s62_s24, %s62_s24 }
  0x1d   :  { %p1596_p11 = scmp.ne.s32.totalorder %s62_s24, %s1595_s1  ;;  %p1601_p13 = scmp.lt.s32.totalorder %s1595_s1, %s1595_s1 }
  0x1f   :  { %p1602_p0 = por %p1601_p13, %p1600_p12 }
  0x21   :  { %p1603_p1 = pnand %p1602_p0, %p1596_p11 }
  0x23   :  { %1606 = shalt.err (!%p1603_p1)
}
  0x24   :  { %s1708_s10 = smov 128   ;;  %s1709_s14 = smov 8  }
  0x25   :  { %67 = dma.hbm_to_vmem [thread:$0]  %s1889_s5, 4096, %s62_s24, [#allocation9], %s1708_s10, %s1708_s10, %s1709_s14  }
  0x26   :  { %s1607_s19 = scalar_lea.hbm %s1884_s0, 64 }
  0x27   :  { %p1608_p2 = scmp.ne.s32.totalorder %s1884_s0, %s1607_s19  ;;  %p1611_p3 = scmp.lt.u32.totalorder %s1607_s19, %s1884_s0 }
  0x29   :  { %p1613_p4 = pnand %p1611_p3, %p1608_p2 }
  0x2b   :  { %1616 = shalt.err (!%p1613_p4)
}
  0x2c   :  { %s1617_s25 = scalar_lea.vmem %s25_s26, 64  ;;  %p1622_p6 = scmp.lt.s32.totalorder %s25_s26, %s25_s26 }
  0x2d   :  { %p1618_p5 = scmp.ne.s32.totalorder %s25_s26, %s1617_s25  ;;  %p1623_p7 = scmp.lt.s32.totalorder %s1617_s25, %s1617_s25 }
  0x2f   :  { %p1624_p8 = por %p1623_p7, %p1622_p6 }
  0x31   :  { %p1625_p9 = pnand %p1624_p8, %p1618_p5 }
  0x33   :  { %1628 = shalt.err (!%p1625_p9)
}
  0x34   :  { %27 = dma.hbm_to_vmem [thread:$0]  %s1884_s0, 64, %s25_s26, [#allocation3]  }
  0x35   :  { %s1710_s27 = smov [#allocation7]   ;;  %s1711_s29 = smov [#allocation10]  }
  0x36   :  { %s47_s28 = sshll.u32 %s1710_s27, 4  ;;  %s75_s30 = sshll.u32 %s1711_s29, 4  ;;  %s48_s28 = int_to_ptr.vmem [resolvable:$true] %s47_s28  ;;  %s76_s30 = int_to_ptr.vmem [resolvable:$true] %s75_s30 }
  0x37   :  { %s1629_s13 = scalar_lea.hbm %s1887_s3, 8192 }
  0x38   :  { %p1630_p10 = scmp.ne.s32.totalorder %s1887_s3, %s1629_s13  ;;  %p1633_p11 = scmp.lt.u32.totalorder %s1629_s13, %s1887_s3 }
  0x3a   :  { %p1635_p12 = pnand %p1633_p11, %p1630_p10 }
  0x3c   :  { %1638 = shalt.err (!%p1635_p12)
}
  0x3d   :  { %s1639_s0 = scalar_lea.vmem %s48_s28, 8192  ;;  %p1644_p0 = scmp.lt.s32.totalorder %s48_s28, %s48_s28 }
  0x3e   :  { %p1640_p13 = scmp.ne.s32.totalorder %s48_s28, %s1639_s0  ;;  %p1645_p1 = scmp.lt.s32.totalorder %s1639_s0, %s1639_s0 }
  0x40   :  { %p1646_p2 = por %p1645_p1, %p1644_p0 }
  0x42   :  { %p1647_p3 = pnand %p1646_p2, %p1640_p13 }
  0x44   :  { %1650 = shalt.err (!%p1647_p3)
}
  0x45   :  { %53 = dma.hbm_to_vmem [thread:$0]  %s1887_s3, 8192, %s48_s28, [#allocation6], %s1708_s10, %s1708_s10, %s1709_s14  }
  0x46   :  { %s1651_s21 = scalar_lea.hbm %s1891_s7, 2048 }
  0x47   :  { %p1652_p4 = scmp.ne.s32.totalorder %s1891_s7, %s1651_s21  ;;  %p1655_p5 = scmp.lt.u32.totalorder %s1651_s21, %s1891_s7 }
  0x49   :  { %p1657_p6 = pnand %p1655_p5, %p1652_p4 }
  0x4b   :  { %1660 = shalt.err (!%p1657_p6)
}
  0x4c   :  { %s1661_s24 = scalar_lea.vmem %s76_s30, 2048  ;;  %p1666_p8 = scmp.lt.s32.totalorder %s76_s30, %s76_s30 }
  0x4d   :  { %p1662_p7 = scmp.ne.s32.totalorder %s76_s30, %s1661_s24  ;;  %p1667_p9 = scmp.lt.s32.totalorder %s1661_s24, %s1661_s24 }
  0x4f   :  { %p1668_p10 = por %p1667_p9, %p1666_p8 }
  0x51   :  { %p1669_p11 = pnand %p1668_p10, %p1662_p7 }
  0x53   :  { %1672 = shalt.err (!%p1669_p11)
}
  0x54   :  { %s1712_s3 = smov 64   ;;  %s1713_s10 = smov 4  }
  0x55   :  { %81 = dma.hbm_to_vmem [thread:$0]  %s1891_s7, 2048, %s76_s30, [#allocation9], %s1712_s3, %s1712_s3, %s1713_s10  }
  0x56   :  { %1695 = dma.done.wait [#allocation3], 64  }
  0x57   :  { %1696 = vsyncadd [#allocation3], 4294967232 }
  0x58   :  { %1697 = dma.done.wait [#allocation6], 9472  }
  0x59   :  { %1698 = vsyncadd [#allocation6], 4294957824 }
  0x5a   :  { %1699 = dma.done.wait [#allocation9], 6144  }
  0x5b   :  { %1700 = vsyncadd [#allocation9], 4294961152  ;;  %v1714_v0 = vmov 0   ;;  %v1385_v1 = vld [vmem:[#allocation5 + $0x4] ss:$16 sps:$4 sm:$0xff]   ;;  %vm187_vm0 = vcmask 1041408  }
  0x5c   :  { %232 = vmatprep.mubr.bf16.mxu1 %v1714_v0  ;;  %v1387_v2 = vld [vmem:[#allocation5] ss:$16 sps:$4 sm:$0xff]   ;;  %200 = vmatprep.subr.bf16.mxu1 %v1385_v1  ;;  %v1388_v3 = vld [vmem:[#allocation5 + $0x24] ss:$16 sps:$4 sm:$0xff]   ;;  %v1395_v11 = vld [vmem:[#allocation5 + $0xc] ss:$16 sps:$4 sm:$0xff]  }
  0x5d   :  { %v109_v4 = vld [vmem:[#allocation5 + $0x40] sm:$0x33]  ;;  %201 = vmatpush1.bf16.msra.mxu1 %v1387_v2  ;;  %v1401_v8 = vld [vmem:[#allocation7 + $0x4] ss:$8 sps:$4 sm:$0xff]   ;;  %v1403_v9 = vld [vmem:[#allocation7] ss:$8 sps:$4 sm:$0xff]  }
  0x5e   :  { %v1390_v5 = vld [vmem:[#allocation5 + $0x20] ss:$16 sps:$4 sm:$0xff]   ;;  %202 = vmatprep.subr.bf16.mxu1 %v1388_v3  ;;  %v1224_v6 = vcombine.high %v109_v4, %v109_v4  ;;  %v1223_v7 = vcombine.low %v109_v4, %v109_v4  ;;  %v1404_v12 = vld [vmem:[#allocation7 + $0x14] ss:$8 sps:$4 sm:$0xff]   ;;  %686 = vmatprep.subr.bf16.mxu0 %v1401_v8  ;;  %v100_v14 = vld [vmem:[#allocation2] sm:$0xf] }
  0x5f   :  { %687 = vmatpush1.bf16.msra.mxu0 %v1403_v9  ;;  %v1406_v13 = vld [vmem:[#allocation7 + $0x10] ss:$8 sps:$4 sm:$0xff]   ;;  %vm183_vm1 = vcmask 293888   ;;  %v1398_v16 = vld [vmem:[#allocation5 + $0x2c] ss:$16 sps:$4 sm:$0xff]   ;;  %v113_v9 = vlaneseq }
  0x60   :  { %v189_v10 = vsel %vm187_vm0, %v1223_v7, 0  ;;  %v1393_v15 = vld [vmem:[#allocation5 + $0x8] ss:$16 sps:$4 sm:$0xff]   ;;  %688 = vmatprep.subr.bf16.mxu0 %v1404_v12  ;;  %v1407_v17 = vld [vmem:[#allocation7 + $0x24] ss:$8 sps:$4 sm:$0xff]  }
  0x61   :  { %203 = vmatpush1.bf16.msra.mxu1 %v1390_v5  ;;  %v110_v18 = vld [vmem:[#allocation5 + $0x48] sm:$0x33]  ;;  %v1409_v19 = vld [vmem:[#allocation7 + $0x20] ss:$8 sps:$4 sm:$0xff]   ;;  %v1413_v25 = vld [vmem:[#allocation7 + $0x44] ss:$8 sps:$4 sm:$0xff]  }
  0x62   :  { %1227 = vmatprep.subr.msk.bf16.mxu1 %vm187_vm0, %v1224_v6  ;;  %v1396_v20 = vld [vmem:[#allocation5 + $0x28] ss:$16 sps:$4 sm:$0xff]   ;;  %v1410_v21 = vld [vmem:[#allocation7 + $0x34] ss:$8 sps:$4 sm:$0xff]   ;;  %v1226_v22 = vcombine.high %v110_v18, %v110_v18  ;;  %v1225_v23 = vcombine.low %v110_v18, %v110_v18  ;;  %v1419_v30 = vld [vmem:[#allocation7 + $0x64] ss:$8 sps:$4 sm:$0xff]  }
  0x63   :  { %689 = vmatpush1.bf16.msra.mxu0 %v1406_v13  ;;  %v1412_v24 = vld [vmem:[#allocation7 + $0x30] ss:$8 sps:$4 sm:$0xff]   ;;  %v1415_v27 = vld [vmem:[#allocation7 + $0x40] ss:$8 sps:$4 sm:$0xff]   ;;  %v1416_v28 = vld [vmem:[#allocation7 + $0x54] ss:$8 sps:$4 sm:$0xff]  }
  0x64   :  { %690 = vmatprep.subr.bf16.mxu0 %v1407_v17  ;;  %v195_v26 = vsel %vm187_vm0, %v1225_v23, 0  ;;  %v1418_v29 = vld [vmem:[#allocation7 + $0x50] ss:$8 sps:$4 sm:$0xff]   ;;  %v1421_v31 = vld [vmem:[#allocation7 + $0x60] ss:$8 sps:$4 sm:$0xff]   ;;  %v1838_v12 = vshrl.u32 %v113_v9, 7 }
  0x65   :  { %205 = vmatpush1.bf16.msra.mxu1 %v189_v10  ;;  %v1422_v32 = vld [vmem:[#allocation7 + $0x74] ss:$8 sps:$4 sm:$0xff]   ;;  %v1424_v33 = vld [vmem:[#allocation7 + $0x70] ss:$8 sps:$4 sm:$0xff]   ;;  %v1425_v34 = vld [vmem:[#allocation7 + $0x84] ss:$8 sps:$4 sm:$0xff]  }
  0x66   :  { %241 = vmatprep.subr.bf16.mxu1 %v1395_v11  ;;  %v1427_v35 = vld [vmem:[#allocation7 + $0x80] ss:$8 sps:$4 sm:$0xff]   ;;  %v1428_v36 = vld [vmem:[#allocation7 + $0x94] ss:$8 sps:$4 sm:$0xff]   ;;  %v1430_v37 = vld [vmem:[#allocation7 + $0x90] ss:$8 sps:$4 sm:$0xff]  }
  0x67   :  { %691 = vmatpush1.bf16.msra.mxu0 %v1409_v19  ;;  %v1431_v38 = vld [vmem:[#allocation7 + $0xa4] ss:$8 sps:$4 sm:$0xff]   ;;  %v1433_v39 = vld [vmem:[#allocation7 + $0xa0] ss:$8 sps:$4 sm:$0xff]   ;;  %v1434_v40 = vld [vmem:[#allocation7 + $0xb4] ss:$8 sps:$4 sm:$0xff]  }
  0x68   :  { %1228 = vmatmul.mubr.msk.bf16.vlgmr.msra.gmra.mrb[0].mxu1 %vm183_vm1, %v100_v14  ;;  %692 = vmatprep.subr.bf16.mxu0 %v1410_v21  ;;  %v1436_v41 = vld [vmem:[#allocation7 + $0xb0] ss:$8 sps:$4 sm:$0xff]   ;;  %v1437_v42 = vld [vmem:[#allocation7 + $0xc4] ss:$8 sps:$4 sm:$0xff]   ;;  %v1439_v43 = vld [vmem:[#allocation7 + $0xc0] ss:$8 sps:$4 sm:$0xff]  }
  0x69   :  { %242 = vmatpush1.bf16.msra.mxu1 %v1393_v15  ;;  %273 = vmatprep.mubr.bf16.mxu1 %v1714_v0  ;;  %v1440_v44 = vld [vmem:[#allocation7 + $0xd4] ss:$8 sps:$4 sm:$0xff]   ;;  %v1442_v45 = vld [vmem:[#allocation7 + $0xd0] ss:$8 sps:$4 sm:$0xff]   ;;  %v1443_v46 = vld [vmem:[#allocation7 + $0xe4] ss:$8 sps:$4 sm:$0xff]  }
  0x6a   :  { %243 = vmatprep.subr.bf16.mxu1 %v1398_v16  ;;  %v1445_v47 = vld [vmem:[#allocation7 + $0xe0] ss:$8 sps:$4 sm:$0xff]   ;;  %v1446_v48 = vld [vmem:[#allocation7 + $0xf4] ss:$8 sps:$4 sm:$0xff]   ;;  %v1448_v49 = vld [vmem:[#allocation7 + $0xf0] ss:$8 sps:$4 sm:$0xff]  }
  0x6b   :  { %693 = vmatpush1.bf16.msra.mxu0 %v1412_v24  ;;  %v1451_v50 = vld [vmem:[#allocation7 + $0x104] ss:$8 sps:$4 sm:$0xff]   ;;  %v1497_v51 = vld [vmem:[#allocation8] ss:$8 sps:$4 sm:$0xff]   ;;  %v1502_v53 = vld [vmem:[#allocation8 + $0x14] ss:$8 sps:$4 sm:$0xff]  }
  0x6c   :  { %694 = vmatprep.subr.bf16.mxu0 %v1413_v25  ;;  %v1499_v52 = vld [vmem:[#allocation8 + $0x4] ss:$8 sps:$4 sm:$0xff]   ;;  %v1500_v54 = vld [vmem:[#allocation8 + $0x10] ss:$8 sps:$4 sm:$0xff]   ;;  %v1503_v56 = vld [vmem:[#allocation8 + $0x20] ss:$8 sps:$4 sm:$0xff]  }
  0x6d   :  { %244 = vmatpush1.bf16.msra.mxu1 %v1396_v20  ;;  %v1505_v55 = vld [vmem:[#allocation8 + $0x24] ss:$8 sps:$4 sm:$0xff]   ;;  %v1508_v57 = vld [vmem:[#allocation8 + $0x34] ss:$8 sps:$4 sm:$0xff]   ;;  %v1506_v58 = vld [vmem:[#allocation8 + $0x30] ss:$8 sps:$4 sm:$0xff]  }
  0x6e   :  { %1229 = vmatprep.subr.msk.bf16.mxu1 %vm187_vm0, %v1226_v22  ;;  %v1511_v59 = vld [vmem:[#allocation8 + $0x44] ss:$8 sps:$4 sm:$0xff]   ;;  %v1509_v60 = vld [vmem:[#allocation8 + $0x40] ss:$8 sps:$4 sm:$0xff]   ;;  %v1514_v61 = vld [vmem:[#allocation8 + $0x54] ss:$8 sps:$4 sm:$0xff]  }
  0x6f   :  { %695 = vmatpush1.bf16.msra.mxu0 %v1415_v27  ;;  %v1512_v62 = vld [vmem:[#allocation8 + $0x50] ss:$8 sps:$4 sm:$0xff]   ;;  %v1517_v63 = vld [vmem:[#allocation8 + $0x64] ss:$8 sps:$4 sm:$0xff]   ;;  %v1515_v0 = vld [vmem:[#allocation8 + $0x60] ss:$8 sps:$4 sm:$0xff]  }
  0x70   :  { %696 = vmatprep.subr.bf16.mxu0 %v1416_v28  ;;  %v1520_v1 = vld [vmem:[#allocation8 + $0x74] ss:$8 sps:$4 sm:$0xff]   ;;  %v1518_v2 = vld [vmem:[#allocation8 + $0x70] ss:$8 sps:$4 sm:$0xff]   ;;  %v1523_v3 = vld [vmem:[#allocation8 + $0x84] ss:$8 sps:$4 sm:$0xff]  }
  0x71   :  { %246 = vmatpush1.bf16.msra.mxu1 %v195_v26  ;;  %v1521_v4 = vld [vmem:[#allocation8 + $0x80] ss:$8 sps:$4 sm:$0xff]   ;;  %v1526_v5 = vld [vmem:[#allocation8 + $0x94] ss:$8 sps:$4 sm:$0xff]   ;;  %v1524_v6 = vld [vmem:[#allocation8 + $0x90] ss:$8 sps:$4 sm:$0xff]  }
  0x72   :  { %976 = vmatprep.subr.bf16.mxu1 %v1499_v52  ;;  %v1529_v7 = vld [vmem:[#allocation8 + $0xa4] ss:$8 sps:$4 sm:$0xff]   ;;  %v1527_v8 = vld [vmem:[#allocation8 + $0xa0] ss:$8 sps:$4 sm:$0xff]   ;;  %v1532_v10 = vld [vmem:[#allocation8 + $0xb4] ss:$8 sps:$4 sm:$0xff]  }
  0x73   :  { %697 = vmatpush1.bf16.msra.mxu0 %v1418_v29  ;;  %v1530_v11 = vld [vmem:[#allocation8 + $0xb0] ss:$8 sps:$4 sm:$0xff]   ;;  %v1535_v13 = vld [vmem:[#allocation8 + $0xc4] ss:$8 sps:$4 sm:$0xff]   ;;  %v1841_v15 = vsub.s32 0, %v1838_v12  ;;  %v1849_v18 = vsub.s32 1, %v1838_v12 }
  0x74   :  { %1230 = vmatmul.mubr.msk.bf16.vlgmr.msra.gmra.mrb[4].mxu1 %vm183_vm1, %v100_v14  ;;  %698 = vmatprep.subr.bf16.mxu0 %v1419_v30  ;;  %v1533_v14 = vld [vmem:[#allocation8 + $0xc0] ss:$8 sps:$4 sm:$0xff]   ;;  %v1538_v16 = vld [vmem:[#allocation8 + $0xd4] ss:$8 sps:$4 sm:$0xff]   ;;  %v1846_v17 = vld [vmem:[%s1886_s2] sm:$0xf] }
  0x75   :  { %977 = vmatpush1.bf16.msra.mxu1 %v1497_v51  ;;  %v1536_v19 = vld [vmem:[#allocation8 + $0xd0] ss:$8 sps:$4 sm:$0xff]   ;;  %v116_v20 = vrot.slane %v1846_v17, %v1841_v15  ;;  %v120_v21 = vrot.slane %v1846_v17, %v1849_v18  ;;  %v1469_v52 = vld [vmem:[#allocation7 + $0x164] ss:$8 sps:$4 sm:$0xff]   ;;  %v1496_v9 = vld [vmem:[#allocation7 + $0x1f4] ss:$8 sps:$4 sm:$0xff]  }
  0x76   :  { %978 = vmatprep.subr.bf16.mxu1 %v1502_v53  ;;  %v1464_v51 = vld [vmem:[#allocation7 + $0x150] ss:$8 sps:$4 sm:$0xff]   ;;  %v1467_v53 = vld [vmem:[#allocation7 + $0x160] ss:$8 sps:$4 sm:$0xff]  }
  0x77   :  { %699 = vmatpush1.bf16.msra.mxu0 %v1421_v31  ;;  %v1449_v31 = vld [vmem:[#allocation7 + $0x100] ss:$8 sps:$4 sm:$0xff]  }
  0x78   :  { %700 = vmatprep.subr.bf16.mxu0 %v1422_v32  ;;  %v127_v32 = vsub.s32 3, %v1838_v12 }
  0x79   :  { %979 = vmatpush1.bf16.msra.mxu1 %v1500_v54  ;;  %v1472_v54 = vld [vmem:[#allocation7 + $0x174] ss:$8 sps:$4 sm:$0xff]  }
  0x7a   :  { %980 = vmatprep.subr.bf16.mxu1 %v1505_v55  ;;  %v1470_v55 = vld [vmem:[#allocation7 + $0x170] ss:$8 sps:$4 sm:$0xff]  }
  0x7b   :  { %701 = vmatpush1.bf16.msra.mxu0 %v1424_v33 }
  0x7c   :  { %702 = vmatprep.subr.bf16.mxu0 %v1425_v34  ;;  %v1454_v34 = vld [vmem:[#allocation7 + $0x114] ss:$8 sps:$4 sm:$0xff]  }
  0x7d   :  { %981 = vmatpush1.bf16.msra.mxu1 %v1503_v56  ;;  %v1475_v56 = vld [vmem:[#allocation7 + $0x184] ss:$8 sps:$4 sm:$0xff]  }
  0x7e   :  { %982 = vmatprep.subr.bf16.mxu1 %v1508_v57  ;;  %v1473_v57 = vld [vmem:[#allocation7 + $0x180] ss:$8 sps:$4 sm:$0xff]  }
  0x7f   :  { %703 = vmatpush1.bf16.msra.mxu0 %v1427_v35  ;;  %v1452_v35 = vld [vmem:[#allocation7 + $0x110] ss:$8 sps:$4 sm:$0xff]  }
  0x80   :  { %704 = vmatprep.subr.bf16.mxu0 %v1428_v36  ;;  %v128_v36 = vrot.slane %v1846_v17, %v127_v32  ;;  %v1546_v32 = vld [vmem:[#allocation10] sm:$0xff]  }
  0x81   :  { %983 = vmatpush1.bf16.msra.mxu1 %v1506_v58  ;;  %v1478_v58 = vld [vmem:[#allocation7 + $0x194] ss:$8 sps:$4 sm:$0xff]  }
  0x82   :  { %984 = vmatprep.subr.bf16.mxu1 %v1511_v59  ;;  %v1476_v59 = vld [vmem:[#allocation7 + $0x190] ss:$8 sps:$4 sm:$0xff]  }
  0x83   :  { %705 = vmatpush1.bf16.msra.mxu0 %v1430_v37  ;;  %v1457_v37 = vld [vmem:[#allocation7 + $0x124] ss:$8 sps:$4 sm:$0xff]  }
  0x84   :  { %706 = vmatprep.subr.bf16.mxu0 %v1431_v38 }
  0x85   :  { %985 = vmatpush1.bf16.msra.mxu1 %v1509_v60  ;;  %v1481_v60 = vld [vmem:[#allocation7 + $0x1a4] ss:$8 sps:$4 sm:$0xff]  }
  0x86   :  { %986 = vmatprep.subr.bf16.mxu1 %v1514_v61  ;;  %v1479_v61 = vld [vmem:[#allocation7 + $0x1a0] ss:$8 sps:$4 sm:$0xff]  }
  0x87   :  { %707 = vmatpush1.bf16.msra.mxu0 %v1433_v39 }
  0x88   :  { %708 = vmatprep.subr.bf16.mxu0 %v1434_v40  ;;  %v1455_v40 = vld [vmem:[#allocation7 + $0x120] ss:$8 sps:$4 sm:$0xff]  }
  0x89   :  { %987 = vmatpush1.bf16.msra.mxu1 %v1512_v62  ;;  %v1484_v62 = vld [vmem:[#allocation7 + $0x1b4] ss:$8 sps:$4 sm:$0xff]  }
  0x8a   :  { %988 = vmatprep.subr.bf16.mxu1 %v1517_v63  ;;  %v1482_v63 = vld [vmem:[#allocation7 + $0x1b0] ss:$8 sps:$4 sm:$0xff]  }
  0x8b   :  { %709 = vmatpush1.bf16.msra.mxu0 %v1436_v41 }
  0x8c   :  { %710 = vmatprep.subr.bf16.mxu0 %v1437_v42 }
  0x8d   :  { %989 = vmatpush1.bf16.msra.mxu1 %v1515_v0  ;;  %v1487_v0 = vld [vmem:[#allocation7 + $0x1c4] ss:$8 sps:$4 sm:$0xff]  }
  0x8e   :  { %990 = vmatprep.subr.bf16.mxu1 %v1520_v1  ;;  %v1485_v1 = vld [vmem:[#allocation7 + $0x1c0] ss:$8 sps:$4 sm:$0xff]  }
  0x8f   :  { %711 = vmatpush1.bf16.msra.mxu0 %v1439_v43  ;;  %v1460_v43 = vld [vmem:[#allocation7 + $0x134] ss:$8 sps:$4 sm:$0xff]  }
  0x90   :  { %712 = vmatprep.subr.bf16.mxu0 %v1440_v44 }
  0x91   :  { %991 = vmatpush1.bf16.msra.mxu1 %v1518_v2  ;;  %v123_v2 = vsub.s32 2, %v1838_v12  ;;  %v1541_v12 = vld [vmem:[#allocation8 + $0xe4] ss:$8 sps:$4 sm:$0xff]  }
  0x92   :  { %992 = vmatprep.subr.bf16.mxu1 %v1523_v3  ;;  %v1490_v3 = vld [vmem:[#allocation7 + $0x1d4] ss:$8 sps:$4 sm:$0xff]  }
  0x93   :  { %713 = vmatpush1.bf16.msra.mxu0 %v1442_v45 }
  0x94   :  { %714 = vmatprep.subr.bf16.mxu0 %v1443_v46  ;;  %v1458_v46 = vld [vmem:[#allocation7 + $0x130] ss:$8 sps:$4 sm:$0xff]  }
  0x95   :  { %993 = vmatpush1.bf16.msra.mxu1 %v1521_v4  ;;  %v1488_v4 = vld [vmem:[#allocation7 + $0x1d0] ss:$8 sps:$4 sm:$0xff]  }
  0x96   :  { %994 = vmatprep.subr.bf16.mxu1 %v1526_v5  ;;  %v124_v5 = vrot.slane %v1846_v17, %v123_v2  ;;  %v1542_v17 = vld [vmem:[#allocation8 + $0xf0] ss:$8 sps:$4 sm:$0xff]  }
  0x97   :  { %715 = vmatpush1.bf16.msra.mxu0 %v1445_v47 }
  0x98   :  { %716 = vmatprep.subr.bf16.mxu0 %v1446_v48  ;;  %v1463_v48 = vld [vmem:[#allocation7 + $0x144] ss:$8 sps:$4 sm:$0xff]  }
  0x99   :  { %995 = vmatpush1.bf16.msra.mxu1 %v1524_v6  ;;  %v1493_v6 = vld [vmem:[#allocation7 + $0x1e4] ss:$8 sps:$4 sm:$0xff]  }
  0x9a   :  { %996 = vmatprep.subr.bf16.mxu1 %v1529_v7  ;;  %v1491_v7 = vld [vmem:[#allocation7 + $0x1e0] ss:$8 sps:$4 sm:$0xff]  }
  0x9b   :  { %717 = vmatpush1.bf16.msra.mxu0 %v1448_v49  ;;  %v1461_v49 = vld [vmem:[#allocation7 + $0x140] ss:$8 sps:$4 sm:$0xff]  }
  0x9c   :  { %727 = vmatprep.subr.bf16.mxu0 %v1451_v50  ;;  %v1466_v50 = vld [vmem:[#allocation7 + $0x154] ss:$8 sps:$4 sm:$0xff]  }
  0x9d   :  { %997 = vmatpush1.bf16.msra.mxu1 %v1527_v8 }
  0x9e   :  { %998 = vmatprep.subr.bf16.mxu1 %v1532_v10  ;;  %v1494_v10 = vld [vmem:[#allocation7 + $0x1f0] ss:$8 sps:$4 sm:$0xff]  }
  0xa1   :  { %999 = vmatpush1.bf16.msra.mxu1 %v1530_v11 }
  0xa2   :  { %1000 = vmatprep.subr.bf16.mxu1 %v1535_v13 }
  0xa5   :  { %1001 = vmatpush1.bf16.msra.mxu1 %v1533_v14  ;;  %v1539_v14 = vld [vmem:[#allocation8 + $0xe0] ss:$8 sps:$4 sm:$0xff]  }
  0xa6   :  { %1002 = vmatprep.subr.bf16.mxu1 %v1538_v16  ;;  %v1544_v16 = vld [vmem:[#allocation8 + $0xf4] ss:$8 sps:$4 sm:$0xff]  }
  0xa9   :  { %1003 = vmatpush1.bf16.msra.mxu1 %v1536_v19  ;;  %v1545_v19 = vld [vmem:[#allocation10 + $0x40] sm:$0xff]  }
  0xaa   :  { %1004 = vmatprep.subr.bf16.mxu1 %v1541_v12 }
  0xad   :  { %1005 = vmatpush1.bf16.msra.mxu1 %v1539_v14 }
  0xae   :  { %1006 = vmatprep.subr.bf16.mxu1 %v1544_v16 }
  0xb1   :  { %1007 = vmatpush1.bf16.msra.mxu1 %v1542_v17 }
  0xb2   :  { %1344 = vmatprep.subr.bf16.mxu1 %v1545_v19 }
 0x13b   :  { %v234_v22 = vpop.f32.mrb[0].mxu1 }
 0x13c   :  { %v235_v23 = vadd.f32 %v234_v22, %v116_v20  ;;  %v236_v24 = vpop.f32.mrb[1].mxu1  ;;  %v354_v20 = vld [vmem:[%s1888_s4] sm:$0x3] }
 0x13d   :  { %v237_v25 = vadd.f32 %v236_v24, %v120_v21  ;;  %v238_v26 = vpop.f32.mrb[2].mxu1  ;;  %v359_v21 = vrot.slane %v354_v20, %v1841_v15  ;;  %v363_v22 = vrot.slane %v354_v20, %v1849_v18 }
 0x13e   :  { %v282_v27 = vmax.f32 %v235_v23, 0.0  ;;  %v239_v28 = vpop.f32.mrb[3].mxu1 }
 0x13f   :  { %v283_v29 = vmax.f32 %v237_v25, 0.0 }
 0x140   :  { %v286_v33 = vpack.c.bf16 %v282_v27, %v282_v27 }
 0x141   :  { %v287_v30 = vpack.c.bf16 %v283_v29, %v283_v29 }
 0x143   :  { %718 = vmatprep.mubr.bf16.mxu0 %v287_v30 }
 0x144   :  { %719 = vmatmul.mubr.bf16.vlgmr.msra.gmra.mrb[0].mxu0 %v286_v33 }
 0x145   :  { %728 = vmatpush1.bf16.msra.mxu0 %v1449_v31 }
 0x146   :  { %729 = vmatprep.subr.bf16.mxu0 %v1454_v34  ;;  %v1547_v34 = vld [vmem:[#allocation10 + $0x48] sm:$0xff]  }
 0x147   :  { %v275_v38 = vpop.f32.mrb[4].mxu1 }
 0x148   :  { %v277_v39 = vpop.f32.mrb[5].mxu1  ;;  %v276_v8 = vadd.f32 %v275_v38, %v124_v5  ;;  %v1551_v38 = vld [vmem:[#allocation10 + $0x58] sm:$0xff]  }
 0x149   :  { %730 = vmatpush1.bf16.msra.mxu0 %v1452_v35  ;;  %v278_v41 = vadd.f32 %v277_v39, %v128_v36  ;;  %v279_v42 = vpop.f32.mrb[6].mxu1  ;;  %v1548_v35 = vld [vmem:[#allocation10 + $0x8] sm:$0xff]   ;;  %v1549_v36 = vld [vmem:[#allocation10 + $0x50] sm:$0xff]   ;;  %v1552_v39 = vld [vmem:[#allocation10 + $0x18] sm:$0xff]  }
 0x14a   :  { %731 = vmatprep.subr.bf16.mxu0 %v1457_v37  ;;  %v280_v44 = vpop.f32.mrb[7].mxu1  ;;  %v284_v11 = vmax.f32 %v276_v8, 0.0  ;;  %v1550_v37 = vld [vmem:[#allocation10 + $0x10] sm:$0xff]   ;;  %v1555_v42 = vld [vmem:[#allocation10 + $0x68] sm:$0xff]  }
 0x14b   :  { %v285_v45 = vmax.f32 %v278_v41, 0.0  ;;  %v1554_v41 = vld [vmem:[#allocation10 + $0x20] sm:$0xff]   ;;  %v1557_v44 = vld [vmem:[#allocation10 + $0x70] sm:$0xff]  }
 0x14c   :  { %v288_v13 = vpack.c.bf16 %v284_v11, %v284_v11 }
 0x14d   :  { %732 = vmatpush1.bf16.msra.mxu0 %v1455_v40  ;;  %v289_v47 = vpack.c.bf16 %v285_v45, %v285_v45  ;;  %v1553_v40 = vld [vmem:[#allocation10 + $0x60] sm:$0xff]   ;;  %v1558_v45 = vld [vmem:[#allocation10 + $0x30] sm:$0xff]  }
 0x14e   :  { %733 = vmatprep.subr.bf16.mxu0 %v1460_v43  ;;  %v1556_v43 = vld [vmem:[#allocation10 + $0x28] sm:$0xff]  }
 0x14f   :  { %759 = vmatprep.mubr.bf16.mxu0 %v289_v47  ;;  %v1560_v47 = vld [vmem:[#allocation10 + $0x38] sm:$0xff]  }
 0x151   :  { %734 = vmatpush1.bf16.msra.mxu0 %v1458_v46  ;;  %v1559_v46 = vld [vmem:[#allocation10 + $0x78] sm:$0xff]  }
 0x152   :  { %735 = vmatprep.subr.bf16.mxu0 %v1463_v48  ;;  %v804_v48 = vld [vmem:[%s1890_s6] sm:$0x3]  ;;  %s1715_s6 = smov [#allocation11]  }
 0x153   :  { %s1204_s13 = sshll.u32 %s1715_s6, 4  ;;  %s1205_s13 = int_to_ptr.vmem [resolvable:$true] %s1204_s13 }
 0x154   :  { %s1673_s1 = scalar_lea.vmem %s1205_s13, 128  ;;  %p1678_p13 = scmp.lt.s32.totalorder %s1205_s13, %s1205_s13 }
 0x155   :  { %736 = vmatpush1.bf16.msra.mxu0 %v1461_v49  ;;  %v809_v49 = vrot.slane %v804_v48, %v1841_v15  ;;  %p1674_p12 = scmp.ne.s32.totalorder %s1205_s13, %s1673_s1  ;;  %p1679_p0 = scmp.lt.s32.totalorder %s1673_s1, %s1673_s1 }
 0x156   :  { %737 = vmatprep.subr.bf16.mxu0 %v1466_v50  ;;  %v813_v50 = vrot.slane %v804_v48, %v1849_v18 }
 0x157   :  { %p1680_p1 = por %p1679_p0, %p1678_p13 }
 0x159   :  { %738 = vmatpush1.bf16.msra.mxu0 %v1464_v51  ;;  %p1681_p2 = pnand %p1680_p1, %p1674_p12 }
 0x15a   :  { %739 = vmatprep.subr.bf16.mxu0 %v1469_v52 }
 0x15d   :  { %740 = vmatpush1.bf16.msra.mxu0 %v1467_v53 }
 0x15e   :  { %741 = vmatprep.subr.bf16.mxu0 %v1472_v54 }
 0x161   :  { %742 = vmatpush1.bf16.msra.mxu0 %v1470_v55 }
 0x162   :  { %743 = vmatprep.subr.bf16.mxu0 %v1475_v56 }
 0x165   :  { %744 = vmatpush1.bf16.msra.mxu0 %v1473_v57 }
 0x166   :  { %745 = vmatprep.subr.bf16.mxu0 %v1478_v58 }
 0x169   :  { %746 = vmatpush1.bf16.msra.mxu0 %v1476_v59 }
 0x16a   :  { %747 = vmatprep.subr.bf16.mxu0 %v1481_v60 }
 0x16d   :  { %748 = vmatpush1.bf16.msra.mxu0 %v1479_v61 }
 0x16e   :  { %749 = vmatprep.subr.bf16.mxu0 %v1484_v62  ;;  %v1327_v62 = vld [vmem:[%s1892_s8] ss:$0 sm:$0xff] }
 0x171   :  { %750 = vmatpush1.bf16.msra.mxu0 %v1482_v63 }
 0x172   :  { %751 = vmatprep.subr.bf16.mxu0 %v1487_v0 }
 0x175   :  { %752 = vmatpush1.bf16.msra.mxu0 %v1485_v1 }
 0x176   :  { %753 = vmatprep.subr.bf16.mxu0 %v1490_v3 }
 0x179   :  { %754 = vmatpush1.bf16.msra.mxu0 %v1488_v4 }
 0x17a   :  { %755 = vmatprep.subr.bf16.mxu0 %v1493_v6 }
 0x17d   :  { %756 = vmatpush1.bf16.msra.mxu0 %v1491_v7 }
 0x17e   :  { %757 = vmatprep.subr.bf16.mxu0 %v1496_v9 }
 0x181   :  { %758 = vmatpush1.bf16.msra.mxu0 %v1494_v10 }
 0x184   :  { %760 = vmatmul.mubr.bf16.vlgmr.msra.gmra.mrb[0].mxu0 %v288_v13 }
 0x257   :  { %v761_v23 = vpop.f32.mrb[0].mxu0 }
 0x258   :  { %v1366_v24 = vadd.f32 %v761_v23, %v359_v21  ;;  %v763_v25 = vpop.f32.mrb[1].mxu0 }
 0x259   :  { %v1367_v26 = vadd.f32 %v763_v25, %v363_v22  ;;  %v765_v27 = vpop.f32.mrb[2].mxu0 }
 0x25a   :  { %v768_v28 = vmax.f32 %v1366_v24, 0.0  ;;  %v766_v29 = vpop.f32.mrb[3].mxu0 }
 0x25b   :  { %v769_v30 = vmax.f32 %v1367_v26, 0.0 }
 0x25c   :  { %v770_v33 = vpack.c.bf16 %v768_v28, %v768_v28 }
 0x25d   :  { %v771_v31 = vpack.c.bf16 %v769_v30, %v769_v30 }
 0x25f   :  { %1008 = vmatprep.mubr.bf16.mxu1 %v771_v31 }
 0x260   :  { %1009 = vmatmul.mubr.bf16.vlgmr.msra.gmra.mrb[8].mxu1 %v770_v33 }
 0x261   :  { %1345 = vmatpush3.bf16.msra.mxu1 %v1546_v32 }
 0x262   :  { %1346 = vmatprep.subr.bf16.mxu1 %v1547_v34 }
 0x265   :  { %1347 = vmatpush3.bf16.msra.mxu1 %v1548_v35 }
 0x266   :  { %1348 = vmatprep.subr.bf16.mxu1 %v1549_v36 }
 0x269   :  { %1349 = vmatpush3.bf16.msra.mxu1 %v1550_v37 }
 0x26a   :  { %1350 = vmatprep.subr.bf16.mxu1 %v1551_v38 }
 0x26d   :  { %1351 = vmatpush3.bf16.msra.mxu1 %v1552_v39 }
 0x26e   :  { %1352 = vmatprep.subr.bf16.mxu1 %v1553_v40 }
 0x271   :  { %1353 = vmatpush3.bf16.msra.mxu1 %v1554_v41 }
 0x272   :  { %1354 = vmatprep.subr.bf16.mxu1 %v1555_v42 }
 0x275   :  { %1355 = vmatpush3.bf16.msra.mxu1 %v1556_v43 }
 0x276   :  { %1356 = vmatprep.subr.bf16.mxu1 %v1557_v44 }
 0x279   :  { %1357 = vmatpush3.bf16.msra.mxu1 %v1558_v45 }
 0x27a   :  { %1358 = vmatprep.subr.bf16.mxu1 %v1559_v46 }
 0x27d   :  { %1359 = vmatpush3.bf16.msra.mxu1 %v1560_v47 }
 0x333   :  { %v1010_v51 = vpop.f32.mrb[8].mxu1 }
 0x334   :  { %v1011_v52 = vadd.f32 %v1010_v51, %v809_v49  ;;  %v1012_v53 = vpop.f32.mrb[9].mxu1 }
 0x335   :  { %v1013_v54 = vadd.f32 %v1012_v53, %v813_v50  ;;  %v1014_v55 = vpop.f32.mrb[10].mxu1 }
 0x336   :  { %v1017_v56 = vmax.f32 %v1011_v52, 0.0  ;;  %v1015_v57 = vpop.f32.mrb[11].mxu1 }
 0x337   :  { %v1018_v58 = vmax.f32 %v1013_v54, 0.0 }
 0x338   :  { %v1019_v60 = vpack.c.bf16 %v1017_v56, %v1017_v56 }
 0x339   :  { %v1020_v59 = vpack.c.bf16 %v1018_v58, %v1018_v58 }
 0x33b   :  { %1188 = vmatprep.mubr.bf16.mxu1 %v1020_v59 }
 0x33c   :  { %1189 = vmatmul.mubr.bf16.vlgmr.msra.gmra.mrb[12].mxu1 %v1019_v60 }
 0x40f   :  { %v1360_v61 = vpop.f32.mrb[12].mxu1 }
 0x410   :  { %v1361_v15 = vpop.f32.mrb[13].mxu1 }
 0x411   :  { %v1362_v63 = vadd.f32 %v1361_v15, %v1360_v61  ;;  %v1363_v18 = vpop.f32.mrb[14].mxu1 }
 0x412   :  { %v1364_v0 = vpop.f32.mrb[15].mxu1 }
 0x413   :  { %v1191_v1 = vadd.f32 %v1362_v63, %v1327_v62 }
 0x415   :  { %1561 = vtanh.f32 %v1191_v1 }
 0x41f   :  { %v1562_v2 = vpop.eup %1561 }
 0x420   :  { %1197 = vst [vmem:[#allocation11] sm:$0xff] %v1562_v2 }
 0x421   :  { %1684 = shalt.err (!%p1681_p2)
}
 0x422   :  { %s1685_s16 = scalar_lea.hbm %s1893_s9, 128 }
 0x423   :  { %p1686_p3 = scmp.ne.s32.totalorder %s1893_s9, %s1685_s16  ;;  %p1689_p4 = scmp.lt.u32.totalorder %s1685_s16, %s1893_s9 }
 0x425   :  { %p1691_p5 = pnand %p1689_p4, %p1686_p3 }
 0x427   :  { %1694 = shalt.err (!%p1691_p5)
}
 0x428   :  { %1207 = dma.vmem_to_hbm [thread:$0]  %s1205_s13, 128, %s1893_s9, [#allocation4]  }
 0x429   :  { %1701 = dma.done.wait [#allocation4], 128  }
 0x42a   :  { %1702 = vsyncadd [#allocation4], 4294967168 }
 0x42b   :  { %1211 = vsyncpa [#allocation3], 1 }
 0x42c   :  { %1212 = vsyncpa [#allocation6], 1 }
 0x42d   :  { %1213 = vsyncpa [#allocation9], 1 }
 0x42e   :  { %1214 = vsyncpa [#allocation4], 1 }

</bundles_post_ra>
